<compile_context>
chip_gen: v6e
topology: v6e:2x2x1
jax: 0.10.0
libtpu: 0.0.40
codegen_flags: <defaults>
</compile_context>

<pallas_src>
import math

import jax
import jax.numpy as jnp
from jax.experimental import pallas as pl
from jax.experimental.pallas import tpu as pltpu


def make_pe_table(d_model: int, max_len: int = 5000) -> jnp.ndarray:
    """Reproduce TimestepEncoding.__init__ buffer `pe` (shape (max_len, d_model), f32)."""
    position = jnp.arange(0, max_len, dtype=jnp.float32)[:, None]            # (max_len, 1)
    div_term = jnp.exp(
        jnp.arange(0, d_model, 2, dtype=jnp.float32)
        * -(math.log(10000.0) / d_model)
    )                                                                         # (ceil(d/2),)
    angles = position * div_term                                              # (max_len, ceil(d/2))
    pe = jnp.zeros((max_len, d_model), dtype=jnp.float32)
    pe = pe.at[:, 0::2].set(jnp.sin(angles))
    # For odd d_model the reference PyTorch code would error; this matches the
    # common even-d_model behaviour (cos truncated to d_model // 2 columns).
    pe = pe.at[:, 1::2].set(jnp.cos(angles)[:, : d_model // 2])
    return pe


def _add_pe_kernel(x_ref, pe_ref, o_ref):
    # x_ref / o_ref: (TB, TC);  pe_ref: (1, TC) f32 -> sublane-broadcast add.
    # Add in f32 to match PyTorch's (x + f32 buffer) promotion semantics.
    o_ref[...] = (x_ref[...].astype(jnp.float32) + pe_ref[...]).astype(o_ref.dtype)


def _round_up(v: int, m: int) -> int:
    return ((v + m - 1) // m) * m


def timestep_encoding_forward(x: jnp.ndarray, pe_row: jnp.ndarray,
                              *, force_pallas: bool = False,
                              donate_x: bool = False) -> jnp.ndarray:
    """x: (B, L, D); pe_row: (1, L*D) f32. Returns x + pe (broadcast over batch)."""
    B, L, D = x.shape
    N = L * D
    assert pe_row.shape == (1, N)

    out_dtype = jnp.promote_types(x.dtype, pe_row.dtype)   # PyTorch promotion parity

    # Tiny problems: per-grid-step + launch overhead dominates; let XLA fuse it.
    if not force_pallas and B * N * x.dtype.itemsize < (1 << 20):
        return (x.astype(jnp.float32) + pe_row.reshape(1, L, D)).astype(out_dtype)

    x2 = x.reshape(B, N)                      # lane-dense view (bitcast-able reshape)
    itemsize = x2.dtype.itemsize

    # ---- tile sizing ------------------------------------------------------
    LANE = 128
    SUB = max(8, 8 * (4 // itemsize))         # dtype-aware sublane tile: f32->8, bf16->16, int8->32
    TARGET_BYTES = 2 << 20                    # ~2 MiB x block (v6e sweep: ~86% of roofline)
    target_elems = max(TARGET_BYTES // itemsize, SUB * LANE)

    if N * SUB <= target_elems:
        # A full row fits the budget: take the whole row and grow the sublane
        # tile so every block still hits the byte target (amortizes per-step
        # overhead for small-N / large-B shapes).
        TC = N
        TB = min(B, _round_up(max(SUB, target_elems // N), SUB))
    else:
        TB = min(B, SUB)
        TC = max(LANE, ((target_elems // TB) // LANE) * LANE)
        if TC >= N:
            TC = N

    n_c = pl.cdiv(N, TC)
    n_b = pl.cdiv(B, TB)

    # Only alias x -> out when it is actually reusable (same dtype / byte size).
    aliases = {0: 0} if (donate_x and x2.dtype == out_dtype) else {}

    out2 = pl.pallas_call(
        _add_pe_kernel,
        out_shape=jax.ShapeDtypeStruct((B, N), out_dtype),
        # Column index OUTER, batch index INNER -> the pe block index is
        # constant across consecutive steps, so the pe tile stays VMEM-resident.
        grid=(n_c, n_b),
        in_specs=[
            pl.BlockSpec((TB, TC), lambda c, b: (b, c)),   # x
            pl.BlockSpec((1, TC), lambda c, b: (0, c)),    # pe row (broadcast over batch)
        ],
        out_specs=pl.BlockSpec((TB, TC), lambda c, b: (b, c)),
        input_output_aliases=aliases,
        compiler_params=pltpu.CompilerParams(
            dimension_semantics=("parallel", "parallel"),
            # 2 MiB blocks, double-buffered x + out + pe: raise scoped VMEM so
            # v5e's 16 MiB default does not OOM; trivially fits v6e/v7x.
            vmem_limit_bytes=64 << 20,
        ),
    )(x2, pe_row)

    return out2.reshape(B, L, D)


class TimestepEncoding:
    """JAX/Pallas port of the PyTorch TimestepEncoding module."""

    def __init__(self, d_model: int, max_len: int = 5000):
        self.d_model = d_model
        self.max_len = max_len
        self.pe = make_pe_table(d_model, max_len)      # (max_len, d_model) f32 buffer
        self._pe_row_cache = {}                        # hoisted per-(L) slice/reshape

    def _pe_row(self, L: int) -> jnp.ndarray:
        row = self._pe_row_cache.get(L)
        if row is None:
            row = self.pe[:L].reshape(1, L * self.d_model)
            self._pe_row_cache[L] = row
        return row

    def __call__(self, x: jnp.ndarray, *, force_pallas: bool = False,
                 donate_x: bool = False) -> jnp.ndarray:
        B, L, D = x.shape
        assert D == self.d_model and L <= self.max_len
        return timestep_encoding_forward(x, self._pe_row(L),
                                         force_pallas=force_pallas,
                                         donate_x=donate_x)


if __name__ == "__main__":
    B, L, D = 2, 8, 32
    max_len = 64

    key = jax.random.PRNGKey(0)
    x = jax.random.normal(key, (B, L, D), dtype=jnp.float32)

    enc = TimestepEncoding(D, max_len=max_len)

    # force_pallas=True so the tiny smoke-test shape exercises the kernel path
    # (production callers at this size would take the fused-XLA fallback).
    out = enc(x, force_pallas=True)
    out = jax.block_until_ready(out)

    # reference check (pure JAX, mirrors the PyTorch forward)
    ref = x + enc.pe[None, :L, :]
    assert out.shape == (B, L, D)
    assert out.dtype == jnp.float32
    assert jnp.allclose(out, ref, atol=1e-6), "mismatch vs reference"

    print("KERNEL_OK")
</pallas_src>

<mosaic_0001>
module attributes {stable_mosaic.version = 11 : i64} {
  func.func @_add_pe_kernel(%arg0: i32, %arg1: i32, %arg2: memref<2x256xf32, #tpu.memory_space<vmem>>, %arg3: memref<1x256xf32, #tpu.memory_space<vmem>>, %arg4: memref<2x256xf32, #tpu.memory_space<vmem>>) attributes {dimension_semantics = [#tpu.dimension_semantics<parallel>, #tpu.dimension_semantics<parallel>], iteration_bounds = array<i64: 1, 1>, scalar_prefetch = 0 : i64, scratch_operands = 0 : i64, tpu.core_type = #tpu.core_type<tc>, window_params = [{transform_indices = @transform_0, window_bounds = array<i64: 2, 256>}, {transform_indices = @transform_1, window_bounds = array<i64: 1, 256>}, {transform_indices = @transform_2, window_bounds = array<i64: 2, 256>}]} {
    %c0 = arith.constant 0 : index
    %c0_0 = arith.constant 0 : index
    %0 = vector.load %arg2[%c0, %c0_0] : memref<2x256xf32, #tpu.memory_space<vmem>>, vector<2x256xf32>
    %c0_1 = arith.constant 0 : index
    %c0_2 = arith.constant 0 : index
    %1 = vector.load %arg3[%c0_1, %c0_2] : memref<1x256xf32, #tpu.memory_space<vmem>>, vector<1x256xf32>
    %2 = vector.broadcast %1 : vector<1x256xf32> to vector<2x256xf32>
    %3 = arith.addf %0, %2 : vector<2x256xf32>
    %c0_3 = arith.constant 0 : index
    %c0_4 = arith.constant 0 : index
    %4 = vector.load %arg4[%c0_3, %c0_4] : memref<2x256xf32, #tpu.memory_space<vmem>>, vector<2x256xf32>
    tpu.vector_store %arg4[%c0_3, %c0_4], %3 {strides = array<i32>} : memref<2x256xf32, #tpu.memory_space<vmem>>, vector<2x256xf32>,
    return
  }
  func.func @transform_0(%arg0: i32, %arg1: i32) -> (i32, i32) {
    %c0_i32 = arith.constant 0 : i32
    return %arg1, %arg0 : i32, i32
  }
  func.func @transform_1(%arg0: i32, %arg1: i32) -> (i32, i32) {
    %c0_i32 = arith.constant 0 : i32
    %c0_i32_0 = arith.constant 0 : i32
    return %c0_i32, %arg0 : i32, i32
  }
  func.func @transform_2(%arg0: i32, %arg1: i32) -> (i32, i32) {
    %c0_i32 = arith.constant 0 : i32
    return %arg1, %arg0 : i32, i32
  }
}

</mosaic_0001>

<bundles_post_ra>
// kernel: tpu_custom_call.1
= control target key start
LH: loop header
LB: loop body
LE: loop exit
PB: predicated region body
PF: predicated region fallthrough
CT: control target
= control target key end

     0   :  { %7 = vsyncpa [#allocation3], 0  ;;  %s172_s0 = inlined_call_operand.hbm [shape: f32[2,256], index: 0, kind: input, shape index: {}]   ;;  %s173_s1 = inlined_call_operand.hbm [shape: f32[1,256], index: 1, kind: input, shape index: {}]   ;;  %s174_s2 = inlined_call_operand.hbm [shape: f32[2,256], index: 2, kind: output, shape index: {}]  }
   0x1   :  { %8 = vsyncpa [#allocation6], 0 }
   0x2   :  { %9 = vsyncpa [#allocation4], 0  ;;  %s144_s9 = smov [#allocation2]   ;;  %s145_s11 = smov [#allocation5]  }
   0x3   :  { %s16_s10 = sshll.u32 %s144_s9, 4  ;;  %s26_s12 = sshll.u32 %s145_s11, 4  ;;  %s17_s10 = int_to_ptr.vmem [resolvable:$true] %s16_s10  ;;  %s27_s12 = int_to_ptr.vmem [resolvable:$true] %s26_s12 }
   0x4   :  { %s86_s13 = scalar_lea.vmem %s17_s10, 64  ;;  %p91_p1 = scmp.lt.s32.totalorder %s17_s10, %s17_s10 }
   0x5   :  { %p87_p0 = scmp.ne.s32.totalorder %s17_s10, %s86_s13  ;;  %p92_p2 = scmp.lt.s32.totalorder %s86_s13, %s86_s13 }
   0x7   :  { %p93_p3 = por %p92_p2, %p91_p1 }
   0x9   :  { %p94_p4 = pnand %p93_p3, %p87_p0 }
   0xb   :  { %97 = shalt.err (!%p94_p4)
}
   0xc   :  { %19 = dma.hbm_to_vmem [thread:$0]  %s172_s0, 64, %s17_s10, [#allocation3]  }
   0xd   :  { %s106_s16 = scalar_lea.vmem %s27_s12, 32  ;;  %p111_p6 = scmp.lt.s32.totalorder %s27_s12, %s27_s12 }
   0xe   :  { %p107_p5 = scmp.ne.s32.totalorder %s27_s12, %s106_s16  ;;  %p112_p7 = scmp.lt.s32.totalorder %s106_s16, %s106_s16 }
  0x10   :  { %p113_p8 = por %p112_p7, %p111_p6 }
  0x12   :  { %p114_p9 = pnand %p113_p8, %p107_p5 }
  0x14   :  { %117 = shalt.err (!%p114_p9)
}
  0x15   :  { %29 = dma.hbm_to_vmem [thread:$0]  %s173_s1, 32, %s27_s12, [#allocation6]  }
  0x16   :  { %138 = dma.done.wait [#allocation3], 64  }
  0x17   :  { %139 = vsyncadd [#allocation3], 4294967232 }
  0x18   :  { %140 = dma.done.wait [#allocation6], 32  }
  0x19   :  { %141 = vsyncadd [#allocation6], 4294967264  ;;  %v39_v0 = vlaneseq  ;;  %v146_v1 = vmov 1983009808   ;;  %v37_v7 = vld [vmem:[#allocation5] sm:$0x3] }
  0x1a   :  { %v49_v2 = vunpack.c.l.s4 %v146_v1  ;;  %v36_v12 = vld [vmem:[#allocation2] sm:$0xf]  ;;  %s147_s0 = smov [#allocation7]  }
  0x1b   :  { %v40_v3 = vshrl.u32 %v39_v0, 7  ;;  %s64_s19 = sshll.u32 %s147_s0, 4  ;;  %s65_s19 = int_to_ptr.vmem [resolvable:$true] %s64_s19 }
  0x1c   :  { %v50_v6 = vunpack.c.0.s8 %v49_v2  ;;  %s118_s1 = scalar_lea.vmem %s65_s19, 64  ;;  %p123_p11 = scmp.lt.s32.totalorder %s65_s19, %s65_s19 }
  0x1d   :  { %v41_v4 = vsub.s32 0, %v40_v3  ;;  %v45_v5 = vsub.s32 1, %v40_v3  ;;  %p119_p10 = scmp.ne.s32.totalorder %s65_s19, %s118_s1  ;;  %p124_p12 = scmp.lt.s32.totalorder %s118_s1, %s118_s1 }
  0x1e   :  { %v53_v10 = vsub.s32 %v50_v6, %v40_v3 }
  0x1f   :  { %v42_v8 = vrot.slane %v37_v7, %v41_v4  ;;  %v46_v9 = vrot.slane %v37_v7, %v45_v5  ;;  %p125_p13 = por %p124_p12, %p123_p11 }
  0x21   :  { %v47_v11 = vcombine.low %v42_v8, %v46_v9  ;;  %p126_p0 = pnand %p125_p13, %p119_p10 }
  0x23   :  { %v54_v13 = vrot.slane %v47_v11, %v53_v10 }
  0x25   :  { %v56_v14 = vadd.f32 %v54_v13, %v36_v12 }
  0x27   :  { %57 = vst [vmem:[#allocation7] sm:$0xf] %v56_v14 }
  0x28   :  { %129 = shalt.err (!%p126_p0)
}
  0x29   :  { %67 = dma.vmem_to_hbm [thread:$0]  %s65_s19, 64, %s174_s2, [#allocation4]  }
  0x2a   :  { %142 = dma.done.wait [#allocation4], 64  }
  0x2b   :  { %143 = vsyncadd [#allocation4], 4294967232 }
  0x2c   :  { %71 = vsyncpa [#allocation3], 1 }
  0x2d   :  { %72 = vsyncpa [#allocation6], 1 }
  0x2e   :  { %73 = vsyncpa [#allocation4], 1 }

</bundles_post_ra>
